<compile_context>
chip_gen: v7x
topology: tpu7x:2x2x1
jax: 0.10.0
libtpu: 0.0.40
codegen_flags: <defaults>
</compile_context>

<pallas_src>
import jax
import jax.numpy as jnp
from jax import lax
from jax.experimental import pallas as pl
from jax.experimental.pallas import tpu as pltpu


def _round_up(x, m):
    return ((x + m - 1) // m) * m


def sigma_md_kernel(x_ref, w_ref, b_ref, o_ref, acc_ref):
    k = pl.program_id(2)

    @pl.when(k == 0)
    def _init():
        acc_ref[...] = jnp.zeros_like(acc_ref)

    # x tile: (TM, TK), w tile: (TN, TK) in native PyTorch layout -> contract
    # on the shared K axis directly (no transpose needed), f32 accumulate.
    acc_ref[...] += lax.dot_general(
        x_ref[...], w_ref[...],
        dimension_numbers=(((1,), (1,)), ((), ())),
        preferred_element_type=jnp.float32,
    )

    @pl.when(k == pl.num_programs(2) - 1)
    def _finalize():
        z = acc_ref[...] + b_ref[...]            # bias broadcast over rows
        # sigmoid(z) = 1 / (1 + exp(-z)); exp and reciprocal both go to EUP.
        y = pl.reciprocal(1.0 + jnp.exp(-z), approx=True)
        o_ref[...] = y.astype(o_ref.dtype)


def sigma_md(x, weight, bias, *, tm=256, tn=256, tk=512):
    """x: (M, K); weight: (N, K) [PyTorch layout]; bias: (N,) -> (M, N)."""
    M, K = x.shape
    N, K2 = weight.shape
    assert K == K2 and bias.shape == (N,)

    # Clamp tiles to the (padded) problem size; keep lane-dense constraints:
    # second-to-last dims multiples of 8, last dims multiples of 128.
    tm = min(tm, _round_up(M, 8))
    tn = min(tn, _round_up(N, 128))
    tk = min(tk, _round_up(K, 128))

    m_pad = _round_up(M, tm)
    n_pad = _round_up(N, tn)
    k_pad = _round_up(K, tk)

    x_p = x if (m_pad, k_pad) == (M, K) else jnp.pad(
        x, ((0, m_pad - M), (0, k_pad - K)))
    w_p = weight if (n_pad, k_pad) == (N, K) else jnp.pad(
        weight, ((0, n_pad - N), (0, k_pad - K)))
    b_p = bias if n_pad == N else jnp.pad(bias, (0, n_pad - N))
    b_p = b_p.reshape(1, n_pad)

    grid = (m_pad // tm, n_pad // tn, k_pad // tk)

    out = pl.pallas_call(
        sigma_md_kernel,
        out_shape=jax.ShapeDtypeStruct((m_pad, n_pad), x.dtype),
        grid_spec=pltpu.PrefetchScalarGridSpec(
            num_scalar_prefetch=0,
            grid=grid,
            in_specs=[
                pl.BlockSpec((tm, tk), lambda i, j, k: (i, k)),   # x
                pl.BlockSpec((tn, tk), lambda i, j, k: (j, k)),   # W (N, K)
                pl.BlockSpec((1, tn), lambda i, j, k: (0, j)),    # bias
            ],
            out_specs=pl.BlockSpec((tm, tn), lambda i, j, k: (i, j)),
            scratch_shapes=[pltpu.VMEM((tm, tn), jnp.float32)],
        ),
        compiler_params=pltpu.CompilerParams(
            dimension_semantics=("parallel", "parallel", "arbitrary"),
            vmem_limit_bytes=32 * 1024 * 1024,
        ),
    )(x_p, w_p, b_p)

    return out[:M, :N]


if __name__ == "__main__":
    key = jax.random.PRNGKey(0)
    kx, kw, kb = jax.random.split(key, 3)

    batch, inp_size, out_size = 8, 32, 32

    x = jax.random.normal(kx, (batch, inp_size), dtype=jnp.float32)
    # Deterministic PyTorch-like uniform(-1/sqrt(K), 1/sqrt(K)) init.
    bound = 1.0 / (inp_size ** 0.5)
    weight = jax.random.uniform(kw, (out_size, inp_size), jnp.float32,
                                minval=-bound, maxval=bound)
    bias = jax.random.uniform(kb, (out_size,), jnp.float32,
                              minval=-bound, maxval=bound)

    out = sigma_md(x, weight, bias)
    out = jax.block_until_ready(out)

    # Cross-check against plain JAX reference (approx reciprocal in the
    # epilogue -> slightly relaxed tolerance; outputs live in (0, 1)).
    ref = jax.nn.sigmoid(x @ weight.T + bias)
    assert out.shape == (batch, out_size)
    assert jnp.allclose(out, ref, atol=2e-3, rtol=2e-3), \
        f"max abs err {jnp.max(jnp.abs(out - ref))}"

    print("KERNEL_OK")
</pallas_src>

<mosaic_0001>
module attributes {stable_mosaic.version = 11 : i64} {
  func.func @sigma_md_kernel(%arg0: i32, %arg1: i32, %arg2: i32, %arg3: memref<8x128xf32, #tpu.memory_space<vmem>>, %arg4: memref<128x128xf32, #tpu.memory_space<vmem>>, %arg5: memref<1x128xf32, #tpu.memory_space<vmem>>, %arg6: memref<8x128xf32, #tpu.memory_space<vmem>>, %arg7: memref<8x128xf32, #tpu.memory_space<vmem>>) attributes {dimension_semantics = [#tpu.dimension_semantics<parallel>, #tpu.dimension_semantics<parallel>, #tpu.dimension_semantics<arbitrary>], iteration_bounds = array<i64: 1, 1, 1>, scalar_prefetch = 0 : i64, scratch_operands = 1 : i64, tpu.core_type = #tpu.core_type<tc>, window_params = [{transform_indices = @transform_0, window_bounds = array<i64: 8, 128>}, {transform_indices = @transform_1, window_bounds = array<i64: 128, 128>}, {transform_indices = @transform_2, window_bounds = array<i64: 1, 128>}, {transform_indices = @transform_3, window_bounds = array<i64: 8, 128>}]} {
    %c0_i32 = arith.constant 0 : i32
    %0 = arith.cmpi eq, %arg2, %c0_i32 : i32
    %1 = arith.extui %0 : i1 to i32
    %c0_i32_0 = arith.constant 0 : i32
    %2 = arith.cmpi ne, %1, %c0_i32_0 : i32
    scf.if %2 {
      %cst_10 = arith.constant 0.000000e+00 : f32
      %12 = vector.broadcast %cst_10 : f32 to vector<8x128xf32>
      %c0_11 = arith.constant 0 : index
      %c0_12 = arith.constant 0 : index
      %13 = vector.load %arg7[%c0_11, %c0_12] : memref<8x128xf32, #tpu.memory_space<vmem>>, vector<8x128xf32>
      tpu.vector_store %arg7[%c0_11, %c0_12], %12 {strides = array<i32>} : memref<8x128xf32, #tpu.memory_space<vmem>>, vector<8x128xf32>,
    } else {
    }
    %c0 = arith.constant 0 : index
    %c0_1 = arith.constant 0 : index
    %3 = vector.load %arg7[%c0, %c0_1] : memref<8x128xf32, #tpu.memory_space<vmem>>, vector<8x128xf32>
    %c0_2 = arith.constant 0 : index
    %c0_3 = arith.constant 0 : index
    %4 = vector.load %arg3[%c0_2, %c0_3] : memref<8x128xf32, #tpu.memory_space<vmem>>, vector<8x128xf32>
    %c0_4 = arith.constant 0 : index
    %c0_5 = arith.constant 0 : index
    %5 = vector.load %arg4[%c0_4, %c0_5] : memref<128x128xf32, #tpu.memory_space<vmem>>, vector<128x128xf32>
    %cst = arith.constant dense<0.000000e+00> : vector<8x128xf32>
    %6 = tpu.matmul %4, %5, %cst {dimension_numbers = #tpu.dot_dimension_numbers<[1], [1], [0], [0], [0, 0, 1, 0], [], []>} : vector<8x128xf32>, vector<128x128xf32>, vector<8x128xf32> -> vector<8x128xf32>
    %7 = arith.addf %3, %6 : vector<8x128xf32>
    %c0_6 = arith.constant 0 : index
    %c0_7 = arith.constant 0 : index
    %8 = vector.load %arg7[%c0_6, %c0_7] : memref<8x128xf32, #tpu.memory_space<vmem>>, vector<8x128xf32>
    tpu.vector_store %arg7[%c0_6, %c0_7], %7 {strides = array<i32>} : memref<8x128xf32, #tpu.memory_space<vmem>>, vector<8x128xf32>,
    %c0_i32_8 = arith.constant 0 : i32
    %9 = arith.cmpi eq, %arg2, %c0_i32_8 : i32
    %10 = arith.extui %9 : i1 to i32
    %c0_i32_9 = arith.constant 0 : i32
    %11 = arith.cmpi ne, %10, %c0_i32_9 : i32
    scf.if %11 {
      %c0_10 = arith.constant 0 : index
      %c0_11 = arith.constant 0 : index
      %12 = vector.load %arg7[%c0_10, %c0_11] : memref<8x128xf32, #tpu.memory_space<vmem>>, vector<8x128xf32>
      %c0_12 = arith.constant 0 : index
      %c0_13 = arith.constant 0 : index
      %13 = vector.load %arg5[%c0_12, %c0_13] : memref<1x128xf32, #tpu.memory_space<vmem>>, vector<1x128xf32>
      %14 = vector.broadcast %13 : vector<1x128xf32> to vector<8x128xf32>
      %15 = arith.addf %12, %14 : vector<8x128xf32>
      %cst_14 = arith.constant 0.000000e+00 : f32
      %16 = vector.broadcast %cst_14 : f32 to vector<8x128xf32>
      %17 = arith.subf %16, %15 : vector<8x128xf32>
      %18 = math.exp %17 : vector<8x128xf32>
      %cst_15 = arith.constant 1.000000e+00 : f32
      %19 = vector.broadcast %cst_15 : f32 to vector<8x128xf32>
      %20 = arith.addf %19, %18 : vector<8x128xf32>
      %21 = tpu.reciprocal %20 {approx = true} : vector<8x128xf32> -> vector<8x128xf32>
      %c0_16 = arith.constant 0 : index
      %c0_17 = arith.constant 0 : index
      %22 = vector.load %arg6[%c0_16, %c0_17] : memref<8x128xf32, #tpu.memory_space<vmem>>, vector<8x128xf32>
      tpu.vector_store %arg6[%c0_16, %c0_17], %21 {strides = array<i32>} : memref<8x128xf32, #tpu.memory_space<vmem>>, vector<8x128xf32>,
    } else {
    }
    return
  }
  func.func @transform_0(%arg0: i32, %arg1: i32, %arg2: i32) -> (i32, i32) {
    %c0_i32 = arith.constant 0 : i32
    return %arg0, %arg2 : i32, i32
  }
  func.func @transform_1(%arg0: i32, %arg1: i32, %arg2: i32) -> (i32, i32) {
    %c0_i32 = arith.constant 0 : i32
    return %arg1, %arg2 : i32, i32
  }
  func.func @transform_2(%arg0: i32, %arg1: i32, %arg2: i32) -> (i32, i32) {
    %c0_i32 = arith.constant 0 : i32
    %c0_i32_0 = arith.constant 0 : i32
    return %c0_i32, %arg1 : i32, i32
  }
  func.func @transform_3(%arg0: i32, %arg1: i32, %arg2: i32) -> (i32, i32) {
    %c0_i32 = arith.constant 0 : i32
    return %arg0, %arg1 : i32, i32
  }
}

</mosaic_0001>

<bundles_post_ra>
// kernel: tpu_custom_call.1
= control target key start
LH: loop header
LB: loop body
LE: loop exit
PB: predicated region body
PF: predicated region fallthrough
CT: control target
= control target key end

     0   :  { %8 = vsyncpa [#allocation4], 0  ;;  %s405_s0 = inlined_call_operand.hbm [shape: f32[8,128], index: 0, kind: input, shape index: {}]   ;;  %s406_s1 = inlined_call_operand.hbm [shape: f32[128,128], index: 1, kind: input, shape index: {}]   ;;  %s407_s2 = inlined_call_operand.vmem [shape: f32[1,128], index: 2, kind: input, shape index: {}]   ;;  %s408_s3 = inlined_call_operand.hbm [shape: f32[8,128], index: 3, kind: output, shape index: {}]  }
   0x1   :  { %9 = vsyncpa [#allocation7], 0 }
   0x2   :  { %10 = vsyncpa [#allocation5], 0  ;;  %s331_s12 = smov [#allocation3]   ;;  %s332_s14 = smov [#allocation6]  }
   0x3   :  { %s17_s13 = sshll.u32 %s331_s12, 4  ;;  %s26_s15 = sshll.u32 %s332_s14, 4  ;;  %s18_s13 = int_to_ptr.vmem [resolvable:$true] %s17_s13  ;;  %s359_s15 = int_to_ptr.vmem [resolvable:$true] %s26_s15 }
   0x4   :  { %s259_s18 = scalar_lea.hbm %s405_s0, 128 }
   0x5   :  { %p260_p0 = scmp.ne.s32.totalorder %s405_s0, %s259_s18  ;;  %p263_p1 = scmp.lt.u32.totalorder %s259_s18, %s405_s0 }
   0x7   :  { %p265_p2 = pnand %p263_p1, %p260_p0 }
   0x9   :  { %268 = shalt.err (!%p265_p2)
}
   0xa   :  { %s269_s23 = scalar_lea.vmem %s18_s13, 128  ;;  %p274_p4 = scmp.lt.s32.totalorder %s18_s13, %s18_s13 }
   0xb   :  { %p270_p3 = scmp.ne.s32.totalorder %s18_s13, %s269_s23  ;;  %p275_p5 = scmp.lt.s32.totalorder %s269_s23, %s269_s23 }
   0xd   :  { %p276_p6 = por %p275_p5, %p274_p4 }
   0xf   :  { %p277_p7 = pnand %p276_p6, %p270_p3 }
  0x11   :  { %280 = shalt.err (!%p277_p7)
}
  0x12   :  { %20 = dma.hbm_to_vmem [thread:$0]  %s405_s0, 128, %s18_s13, [#allocation4]  }
  0x13   :  { %s281_s28 = scalar_lea.hbm %s406_s1, 2048 }
  0x14   :  { %p282_p8 = scmp.ne.s32.totalorder %s406_s1, %s281_s28  ;;  %p285_p9 = scmp.lt.u32.totalorder %s281_s28, %s406_s1 }
  0x16   :  { %p287_p10 = pnand %p285_p9, %p282_p8 }
  0x18   :  { %290 = shalt.err (!%p287_p10)
}
  0x19   :  { %s291_s6 = scalar_lea.vmem %s359_s15, 2048  ;;  %p296_p12 = scmp.lt.s32.totalorder %s359_s15, %s359_s15 }
  0x1a   :  { %p292_p11 = scmp.ne.s32.totalorder %s359_s15, %s291_s6  ;;  %p297_p13 = scmp.lt.s32.totalorder %s291_s6, %s291_s6 }
  0x1c   :  { %p298_p0 = por %p297_p13, %p296_p12 }
  0x1e   :  { %p299_p1 = pnand %p298_p0, %p292_p11 }
  0x20   :  { %302 = shalt.err (!%p299_p1)
}
  0x21   :  { %s333_s0 = smov 128   ;;  %s334_s7 = smov 8  }
  0x22   :  { %32 = dma.hbm_to_vmem [thread:$0]  %s406_s1, 2048, %s359_s15, [#allocation7], %s333_s0, %s333_s0, %s334_s7  }
  0x23   :  { %325 = dma.done.wait [#allocation4], 128  }
  0x24   :  { %326 = vsyncadd [#allocation4], 4294967168 }
  0x25   :  { %327 = dma.done.wait [#allocation7], 2048  }
  0x26   :  { %328 = vsyncadd [#allocation7], 4294965248  ;;  %v335_v0 = vmov 0.0|0.0   ;;  %vm336_vm0 = vmmov 0   ;;  %v337_v1 = vmov 0.0   ;;  %v48_v2 = vld [vmem:[#allocation6] sm:$0xff] }
  0x27   :  { %223 = vmatprep.subr.bf16.mxu0 %v335_v0  ;;  %220 = vmatprep.mubr.msk.f32.mxu0 %vm336_vm0, %v337_v1  ;;  %v49_v3 = vld [vmem:[#allocation6 + $0x8] sm:$0xff]  ;;  %v50_v5 = vld [vmem:[#allocation6 + $0x10] sm:$0xff]  ;;  %v51_v6 = vld [vmem:[#allocation6 + $0x18] sm:$0xff]  ;;  %s338_s11 = smov [#allocation8]  }
  0x28   :  { %v224_v4 = vpack.c.bf16 %v49_v3, %v48_v2  ;;  %v227_v7 = vpack.c.bf16 %v51_v6, %v50_v5  ;;  %v52_v8 = vld [vmem:[#allocation6 + $0x20] sm:$0xff]  ;;  %v53_v9 = vld [vmem:[#allocation6 + $0x28] sm:$0xff]  ;;  %v54_v11 = vld [vmem:[#allocation6 + $0x30] sm:$0xff]  ;;  %s160_s12 = sshll.u32 %s338_s11, 4  ;;  %s161_s12 = int_to_ptr.vmem [resolvable:$true] %s160_s12 }
  0x29   :  { %v230_v10 = vpack.c.bf16 %v53_v9, %v52_v8  ;;  %v55_v12 = vld [vmem:[#allocation6 + $0x38] sm:$0xff]  ;;  %v56_v14 = vld [vmem:[#allocation6 + $0x40] sm:$0xff]  ;;  %v57_v15 = vld [vmem:[#allocation6 + $0x48] sm:$0xff]  ;;  %s303_s13 = scalar_lea.vmem %s161_s12, 128  ;;  %p308_p3 = scmp.lt.s32.totalorder %s161_s12, %s161_s12 }
  0x2a   :  { %225 = vmatpush3.bf16.xpose.msra.mxu0 %v224_v4  ;;  %v233_v13 = vpack.c.bf16 %v55_v12, %v54_v11  ;;  %v236_v16 = vpack.c.bf16 %v57_v15, %v56_v14  ;;  %v58_v17 = vld [vmem:[#allocation6 + $0x50] sm:$0xff]  ;;  %v59_v18 = vld [vmem:[#allocation6 + $0x58] sm:$0xff]  ;;  %v60_v20 = vld [vmem:[#allocation6 + $0x60] sm:$0xff]  ;;  %p304_p2 = scmp.ne.s32.totalorder %s161_s12, %s303_s13  ;;  %p309_p4 = scmp.lt.s32.totalorder %s303_s13, %s303_s13 }
  0x2b   :  { %226 = vmatprep.subr.bf16.mxu0 %v335_v0  ;;  %v239_v19 = vpack.c.bf16 %v59_v18, %v58_v17  ;;  %v61_v21 = vld [vmem:[#allocation6 + $0x68] sm:$0xff]  ;;  %v62_v23 = vld [vmem:[#allocation6 + $0x70] sm:$0xff]  ;;  %v63_v24 = vld [vmem:[#allocation6 + $0x78] sm:$0xff] }
  0x2c   :  { %v242_v22 = vpack.c.bf16 %v61_v21, %v60_v20  ;;  %v245_v25 = vpack.c.bf16 %v63_v24, %v62_v23  ;;  %v47_v26 = vld [vmem:[#allocation3] sm:$0xff]  ;;  %p310_p5 = por %p309_p4, %p308_p3 }
  0x2d   :  { %v170_v27 = vld [vmem:[%s407_s2] ss:$0 sm:$0xff] }
  0x2e   :  { %p311_p6 = pnand %p310_p5, %p304_p2 }
  0x32   :  { %228 = vmatpush3.bf16.xpose.msra.mxu0 %v227_v7 }
  0x33   :  { %229 = vmatprep.subr.bf16.mxu0 %v335_v0 }
  0x3a   :  { %231 = vmatpush3.bf16.xpose.msra.mxu0 %v230_v10 }
  0x3b   :  { %232 = vmatprep.subr.bf16.mxu0 %v335_v0 }
  0x42   :  { %234 = vmatpush3.bf16.xpose.msra.mxu0 %v233_v13 }
  0x43   :  { %235 = vmatprep.subr.bf16.mxu0 %v335_v0 }
  0x4a   :  { %237 = vmatpush3.bf16.xpose.msra.mxu0 %v236_v16 }
  0x4b   :  { %238 = vmatprep.subr.bf16.mxu0 %v335_v0 }
  0x52   :  { %240 = vmatpush3.bf16.xpose.msra.mxu0 %v239_v19 }
  0x53   :  { %241 = vmatprep.subr.bf16.mxu0 %v335_v0 }
  0x5a   :  { %243 = vmatpush3.bf16.xpose.msra.mxu0 %v242_v22 }
  0x5b   :  { %244 = vmatprep.subr.bf16.mxu0 %v335_v0 }
  0x62   :  { %246 = vmatpush3.bf16.xpose.msra.mxu0 %v245_v25 }
  0x69   :  { %221 = vmatmul.mubr.f32.vlgmr.msra.gmra.mrb[0].mxu0 %v47_v26 }
 0x13c   :  { %v130_v28 = vpop.f32.mrb[0].mxu0 }
 0x13d   :  { %v147_v29 = vadd.f32 %v170_v27, %v130_v28  ;;  %v222_v30 = vpop.f32.mrb[1].mxu0 }
 0x13f   :  { %v148_v31 = vsub.f32 0.0, %v147_v29 }
 0x141   :  { %v149_v32 = vmul.f32 1.442695, %v148_v31 }
 0x143   :  { %255 = vpow2.f32 %v149_v32 }
 0x14d   :  { %v256_v33 = vpop.eup %255 }
 0x14e   :  { %v151_v34 = vadd.f32 1.0, %v256_v33 }
 0x150   :  { %257 = vrcp.f32 %v151_v34 }
 0x15a   :  { %v258_v35 = vpop.eup %257 }
 0x15b   :  { %153 = vst [vmem:[#allocation8] sm:$0xff] %v258_v35 }
 0x15c   :  { %314 = shalt.err (!%p311_p6)
}
 0x15d   :  { %s315_s15 = scalar_lea.hbm %s408_s3, 128 }
 0x15e   :  { %p316_p7 = scmp.ne.s32.totalorder %s408_s3, %s315_s15  ;;  %p319_p8 = scmp.lt.u32.totalorder %s315_s15, %s408_s3 }
 0x160   :  { %p321_p9 = pnand %p319_p8, %p316_p7 }
 0x162   :  { %324 = shalt.err (!%p321_p9)
}
 0x163   :  { %163 = dma.vmem_to_hbm [thread:$0]  %s161_s12, 128, %s408_s3, [#allocation5]  }
 0x164   :  { %329 = dma.done.wait [#allocation5], 128  }
 0x165   :  { %330 = vsyncadd [#allocation5], 4294967168 }
 0x166   :  { %167 = vsyncpa [#allocation4], 1 }
 0x167   :  { %168 = vsyncpa [#allocation7], 1 }
 0x168   :  { %169 = vsyncpa [#allocation5], 1 }

</bundles_post_ra>
